<compile_context>
chip_gen: v6e
topology: v6e:2x2x1
jax: 0.10.0
libtpu: 0.0.40
codegen_flags: <defaults>
</compile_context>

<pallas_src>
import functools
import math

import numpy as np
import jax
import jax.numpy as jnp
from jax.experimental import pallas as pl
from jax.experimental.pallas import tpu as pltpu


def _irfft2_kernel(s_ref, w1_ref, w2_ref, o_ref, *, group, h, compute_dtype):
    """One grid step = `group` batch*channel slabs.

    s_ref : (2, G*H, Wf)  f32  stacked [real, imag] half-spectrum rows
    w1_ref: (2, Wf, W)         width-pass weights  [alpha*cos, alpha*sin]*norm
    w2_ref: (2, H, H)          height-pass weights [cos, sin] (shared by slabs)
    o_ref : (G*H, W)           image rows
    """
    cdt = compute_dtype
    sr = s_ref[0].astype(cdt)          # (G*H, Wf)
    si = s_ref[1].astype(cdt)
    dc = w1_ref[0]                     # (Wf, W)
    ds = w1_ref[1]
    # pass 1 (width inverse DFT): fused across all G slabs (rows are free dims)
    ur = (jnp.dot(sr, dc, preferred_element_type=jnp.float32)
          - jnp.dot(si, ds, preferred_element_type=jnp.float32)).astype(cdt)
    ui = (jnp.dot(sr, ds, preferred_element_type=jnp.float32)
          + jnp.dot(si, dc, preferred_element_type=jnp.float32)).astype(cdt)
    # pass 2 (height inverse DFT): shared (H, H) weights applied per slab
    cos_h = w2_ref[0]
    sin_h = w2_ref[1]
    for g in range(group):             # static unroll; `group` is small
        r0 = g * h
        img = (jnp.dot(cos_h, ur[r0:r0 + h, :], preferred_element_type=jnp.float32)
               - jnp.dot(sin_h, ui[r0:r0 + h, :], preferred_element_type=jnp.float32))
        o_ref[r0:r0 + h, :] = img.astype(o_ref.dtype)


def _round_up(x, m):
    return ((x + m - 1) // m) * m


def _pick_group_size(bc, h, target_rows=512, min_steps=4):
    """Slabs fused per grid step (G) and the number of grid steps.

    Targets ~`target_rows` fused rows per step (measured HBM-pipelining sweet
    spot), keeps G*H a multiple of 8 (sublane rule for the block's second-minor
    dim) and prefers >= `min_steps` grid steps so both v7x TensorCores get at
    least 2 pipelined steps each.  G does not have to divide bc; the wrapper
    zero-pads the slab axis and crops the result.
    """
    align = 8 // math.gcd(h, 8)                    # smallest G with (G*H) % 8 == 0
    g = max(1, target_rows // h)
    g = max(align, (g // align) * align)
    g = min(g, _round_up(bc, align))
    while g > align and pl.cdiv(bc, g) < min_steps:
        g -= align
    return g, pl.cdiv(bc, g)


def _build_constants(h, w, wf, dtype):
    """Inverse-DFT weight matrices with all scaling folded into the width pass."""
    w_full = 2 * (wf - 1)                          # irfft2 width before the [:W] crop
    norm = 1.0 / (h * w_full * 4.0)                # irfft2 1/(H*W_full) and the /4

    # width pass: (Wf, W) cos / sin with Hermitian doubling alpha
    kx = np.arange(wf)[:, None]
    x = np.arange(w)[None, :]
    ang_w = 2.0 * np.pi * kx * x / w_full
    alpha = np.full((wf, 1), 2.0)
    alpha[0, 0] = 1.0
    alpha[-1, 0] = 1.0                             # Nyquist column counted once
    w1 = np.stack([alpha * np.cos(ang_w), alpha * np.sin(ang_w)]) * norm   # (2, Wf, W)

    # height pass: one shared (H, H) cos / sin pair (no kron block-diagonal)
    y = np.arange(h)[:, None]
    ky = np.arange(h)[None, :]
    ang_h = 2.0 * np.pi * y * ky / h
    w2 = np.stack([np.cos(ang_h), np.sin(ang_h)])                          # (2, H, H)
    return (jnp.asarray(w1, dtype=dtype), jnp.asarray(w2, dtype=dtype))


def fourier_image_forward(spectrum, shape, *, compute_dtype=jnp.bfloat16,
                          out_dtype=jnp.float32, target_rows=512, min_steps=4):
    """spectrum: (2, B, C, H, Wf) f32 stacked [real, imag] half-spectrum
    (the learned parameter, stored pre-stacked so forward does no repacking).
    Returns the (B, C, H, W) image.  Use compute_dtype=jnp.float32 for closer
    parity with torch's f32 irfft2 (kernel is HBM-bound at small/medium sizes).
    """
    b, c, h, w = shape
    wf = w // 2 + 1 if w % 2 == 0 else w // 2 + 2
    assert spectrum.shape == (2, b, c, h, wf), (spectrum.shape, (2, b, c, h, wf))
    bc = b * c

    g, steps = _pick_group_size(bc, h, target_rows, min_steps)
    bc_pad = g * steps
    gh = g * h

    spec = spectrum.reshape(2, bc, h, wf)
    if bc_pad != bc:                               # zero slabs, cropped below
        spec = jnp.pad(spec, ((0, 0), (0, bc_pad - bc), (0, 0), (0, 0)))
    spec = spec.reshape(2, bc_pad * h, wf)         # metadata-only reshape

    w1, w2 = _build_constants(h, w, wf, dtype=compute_dtype)

    kernel = functools.partial(_irfft2_kernel, group=g, h=h,
                               compute_dtype=compute_dtype)
    out = pl.pallas_call(
        kernel,
        out_shape=jax.ShapeDtypeStruct((bc_pad * h, w), out_dtype),
        grid=(steps,),
        in_specs=[
            pl.BlockSpec((2, gh, wf), lambda i: (0, i, 0)),   # spectrum rows
            pl.BlockSpec((2, wf, w), lambda i: (0, 0, 0)),    # width weights
            pl.BlockSpec((2, h, h), lambda i: (0, 0, 0)),     # height weights
        ],
        out_specs=pl.BlockSpec((gh, w), lambda i: (i, 0)),
        compiler_params=pltpu.CompilerParams(
            dimension_semantics=("parallel",)),
    )(spec, w1, w2)

    if bc_pad != bc:
        out = out[:bc * h]
    return out.reshape(b, c, h, w)


def init_fourier_image_params(key, shape, std=1.0):
    """Deterministic re-implementation of FourierImage.__init__.

    Returns the spectrum as a single stacked f32 array (2, B, C, H, Wf):
    index 0 = real part, index 1 = imaginary part (kernel-friendly layout,
    no per-forward repacking needed).
    """
    b, c, h, w = shape
    wf = w // 2 + 1 if w % 2 == 0 else w // 2 + 2
    fy = np.fft.fftfreq(h)[:, None]
    fx = np.fft.fftfreq(w)[:wf]
    freq = np.sqrt(fx ** 2 + fy ** 2)                      # (H, Wf)
    scale = 1.0 / np.maximum(freq, 1.0 / max(h, w))
    scale = scale * np.sqrt(float(w * h))
    scale = jnp.asarray(scale, dtype=jnp.float32)

    init_val = jax.random.normal(key, (2, b, c, h, wf), dtype=jnp.float32) * std
    return init_val * scale                                # (2, B, C, H, Wf)


if __name__ == "__main__":
    shape = (2, 4, 16, 16)               # (B, C, H, W)
    key = jax.random.PRNGKey(0)
    spectrum = init_fourier_image_params(key, shape, std=1.0)

    img = fourier_image_forward(spectrum, shape)
    img = jax.block_until_ready(img)

    # Sanity check against the exact (f32/complex64) reference of the torch forward.
    spec_c = spectrum[0] + 1j * spectrum[1]
    ref = jnp.fft.irfft2(spec_c)[:, :, :shape[2], :shape[3]] / 4.0
    err = float(jnp.max(jnp.abs(img - ref)) / jnp.max(jnp.abs(ref)))
    assert err < 5e-2, f"normalized max error too large: {err}"

    print("KERNEL_OK")
</pallas_src>

<mosaic_0001>
module attributes {stable_mosaic.version = 11 : i64} {
  func.func @_irfft2_kernel(%arg0: i32, %arg1: memref<2x32x9xf32, #tpu.memory_space<vmem>>, %arg2: memref<2x9x16xbf16, #tpu.memory_space<vmem>>, %arg3: memref<2x16x16xbf16, #tpu.memory_space<vmem>>, %arg4: memref<32x16xf32, #tpu.memory_space<vmem>>) attributes {dimension_semantics = [#tpu.dimension_semantics<parallel>], iteration_bounds = array<i64: 4>, scalar_prefetch = 0 : i64, scratch_operands = 0 : i64, tpu.core_type = #tpu.core_type<tc>, window_params = [{transform_indices = @transform_0, window_bounds = array<i64: 2, 32, 9>}, {pipeline_mode = #tpu.pipeline_mode<synchronous>, transform_indices = @transform_1, window_bounds = array<i64: 2, 9, 16>}, {pipeline_mode = #tpu.pipeline_mode<synchronous>, transform_indices = @transform_2, window_bounds = array<i64: 2, 16, 16>}, {transform_indices = @transform_3, window_bounds = array<i64: 32, 16>}]} {
    %c0 = arith.constant 0 : index
    %c0_0 = arith.constant 0 : index
    %c0_1 = arith.constant 0 : index
    %0 = vector.load %arg1[%c0, %c0_0, %c0_1] : memref<2x32x9xf32, #tpu.memory_space<vmem>>, vector<1x32x9xf32>
    %1 = vector.shape_cast %0 : vector<1x32x9xf32> to vector<32x9xf32>
    %2 = arith.truncf %1 : vector<32x9xf32> to vector<32x9xbf16>
    %c1 = arith.constant 1 : index
    %c0_2 = arith.constant 0 : index
    %c0_3 = arith.constant 0 : index
    %3 = vector.load %arg1[%c1, %c0_2, %c0_3] : memref<2x32x9xf32, #tpu.memory_space<vmem>>, vector<1x32x9xf32>
    %4 = vector.shape_cast %3 : vector<1x32x9xf32> to vector<32x9xf32>
    %5 = arith.truncf %4 : vector<32x9xf32> to vector<32x9xbf16>
    %c0_4 = arith.constant 0 : index
    %c0_5 = arith.constant 0 : index
    %c0_6 = arith.constant 0 : index
    %6 = vector.load %arg2[%c0_4, %c0_5, %c0_6] : memref<2x9x16xbf16, #tpu.memory_space<vmem>>, vector<1x9x16xbf16>
    %7 = vector.shape_cast %6 : vector<1x9x16xbf16> to vector<9x16xbf16>
    %c1_7 = arith.constant 1 : index
    %c0_8 = arith.constant 0 : index
    %c0_9 = arith.constant 0 : index
    %8 = vector.load %arg2[%c1_7, %c0_8, %c0_9] : memref<2x9x16xbf16, #tpu.memory_space<vmem>>, vector<1x9x16xbf16>
    %9 = vector.shape_cast %8 : vector<1x9x16xbf16> to vector<9x16xbf16>
    %cst = arith.constant dense<0.000000e+00> : vector<32x16xf32>
    %10 = tpu.matmul %2, %7, %cst {dimension_numbers = #tpu.dot_dimension_numbers<[1], [0], [0], [1], [0, 0, 1, 1], [], []>} : vector<32x9xbf16>, vector<9x16xbf16>, vector<32x16xf32> -> vector<32x16xf32>
    %cst_10 = arith.constant dense<0.000000e+00> : vector<32x16xf32>
    %11 = tpu.matmul %5, %9, %cst_10 {dimension_numbers = #tpu.dot_dimension_numbers<[1], [0], [0], [1], [0, 0, 1, 1], [], []>} : vector<32x9xbf16>, vector<9x16xbf16>, vector<32x16xf32> -> vector<32x16xf32>
    %12 = arith.subf %10, %11 : vector<32x16xf32>
    %13 = arith.truncf %12 : vector<32x16xf32> to vector<32x16xbf16>
    %cst_11 = arith.constant dense<0.000000e+00> : vector<32x16xf32>
    %14 = tpu.matmul %2, %9, %cst_11 {dimension_numbers = #tpu.dot_dimension_numbers<[1], [0], [0], [1], [0, 0, 1, 1], [], []>} : vector<32x9xbf16>, vector<9x16xbf16>, vector<32x16xf32> -> vector<32x16xf32>
    %cst_12 = arith.constant dense<0.000000e+00> : vector<32x16xf32>
    %15 = tpu.matmul %5, %7, %cst_12 {dimension_numbers = #tpu.dot_dimension_numbers<[1], [0], [0], [1], [0, 0, 1, 1], [], []>} : vector<32x9xbf16>, vector<9x16xbf16>, vector<32x16xf32> -> vector<32x16xf32>
    %16 = arith.addf %14, %15 : vector<32x16xf32>
    %17 = arith.truncf %16 : vector<32x16xf32> to vector<32x16xbf16>
    %c0_13 = arith.constant 0 : index
    %c0_14 = arith.constant 0 : index
    %c0_15 = arith.constant 0 : index
    %18 = vector.load %arg3[%c0_13, %c0_14, %c0_15] : memref<2x16x16xbf16, #tpu.memory_space<vmem>>, vector<1x16x16xbf16>
    %19 = vector.shape_cast %18 : vector<1x16x16xbf16> to vector<16x16xbf16>
    %c1_16 = arith.constant 1 : index
    %c0_17 = arith.constant 0 : index
    %c0_18 = arith.constant 0 : index
    %20 = vector.load %arg3[%c1_16, %c0_17, %c0_18] : memref<2x16x16xbf16, #tpu.memory_space<vmem>>, vector<1x16x16xbf16>
    %21 = vector.shape_cast %20 : vector<1x16x16xbf16> to vector<16x16xbf16>
    %22 = vector.extract_strided_slice %13 {offsets = [0, 0], sizes = [16, 16], strides = [1, 1]} : vector<32x16xbf16> to vector<16x16xbf16>
    %cst_19 = arith.constant dense<0.000000e+00> : vector<16x16xf32>
    %23 = tpu.matmul %19, %22, %cst_19 {dimension_numbers = #tpu.dot_dimension_numbers<[1], [0], [0], [1], [0, 0, 1, 1], [], []>} : vector<16x16xbf16>, vector<16x16xbf16>, vector<16x16xf32> -> vector<16x16xf32>
    %24 = vector.extract_strided_slice %17 {offsets = [0, 0], sizes = [16, 16], strides = [1, 1]} : vector<32x16xbf16> to vector<16x16xbf16>
    %cst_20 = arith.constant dense<0.000000e+00> : vector<16x16xf32>
    %25 = tpu.matmul %21, %24, %cst_20 {dimension_numbers = #tpu.dot_dimension_numbers<[1], [0], [0], [1], [0, 0, 1, 1], [], []>} : vector<16x16xbf16>, vector<16x16xbf16>, vector<16x16xf32> -> vector<16x16xf32>
    %26 = arith.subf %23, %25 : vector<16x16xf32>
    %c0_21 = arith.constant 0 : index
    %c0_22 = arith.constant 0 : index
    %27 = vector.load %arg4[%c0_21, %c0_22] : memref<32x16xf32, #tpu.memory_space<vmem>>, vector<16x16xf32>
    tpu.vector_store %arg4[%c0_21, %c0_22], %26 {strides = array<i32>} : memref<32x16xf32, #tpu.memory_space<vmem>>, vector<16x16xf32>,
    %28 = vector.extract_strided_slice %13 {offsets = [16, 0], sizes = [16, 16], strides = [1, 1]} : vector<32x16xbf16> to vector<16x16xbf16>
    %cst_23 = arith.constant dense<0.000000e+00> : vector<16x16xf32>
    %29 = tpu.matmul %19, %28, %cst_23 {dimension_numbers = #tpu.dot_dimension_numbers<[1], [0], [0], [1], [0, 0, 1, 1], [], []>} : vector<16x16xbf16>, vector<16x16xbf16>, vector<16x16xf32> -> vector<16x16xf32>
    %30 = vector.extract_strided_slice %17 {offsets = [16, 0], sizes = [16, 16], strides = [1, 1]} : vector<32x16xbf16> to vector<16x16xbf16>
    %cst_24 = arith.constant dense<0.000000e+00> : vector<16x16xf32>
    %31 = tpu.matmul %21, %30, %cst_24 {dimension_numbers = #tpu.dot_dimension_numbers<[1], [0], [0], [1], [0, 0, 1, 1], [], []>} : vector<16x16xbf16>, vector<16x16xbf16>, vector<16x16xf32> -> vector<16x16xf32>
    %32 = arith.subf %29, %31 : vector<16x16xf32>
    %c16 = arith.constant 16 : index
    %c0_25 = arith.constant 0 : index
    %33 = vector.load %arg4[%c16, %c0_25] : memref<32x16xf32, #tpu.memory_space<vmem>>, vector<16x16xf32>
    tpu.vector_store %arg4[%c16, %c0_25], %32 {strides = array<i32>} : memref<32x16xf32, #tpu.memory_space<vmem>>, vector<16x16xf32>,
    return
  }
  func.func @transform_0(%arg0: i32) -> (i32, i32, i32) {
    %c0_i32 = arith.constant 0 : i32
    %c0_i32_0 = arith.constant 0 : i32
    %c0_i32_1 = arith.constant 0 : i32
    return %c0_i32, %arg0, %c0_i32_0 : i32, i32, i32
  }
  func.func @transform_1(%arg0: i32) -> (i32, i32, i32) {
    %c0_i32 = arith.constant 0 : i32
    %c0_i32_0 = arith.constant 0 : i32
    %c0_i32_1 = arith.constant 0 : i32
    %c0_i32_2 = arith.constant 0 : i32
    return %c0_i32, %c0_i32_0, %c0_i32_1 : i32, i32, i32
  }
  func.func @transform_2(%arg0: i32) -> (i32, i32, i32) {
    %c0_i32 = arith.constant 0 : i32
    %c0_i32_0 = arith.constant 0 : i32
    %c0_i32_1 = arith.constant 0 : i32
    %c0_i32_2 = arith.constant 0 : i32
    return %c0_i32, %c0_i32_0, %c0_i32_1 : i32, i32, i32
  }
  func.func @transform_3(%arg0: i32) -> (i32, i32) {
    %c0_i32 = arith.constant 0 : i32
    %c0_i32_0 = arith.constant 0 : i32
    return %arg0, %c0_i32 : i32, i32
  }
}

</mosaic_0001>

<bundles_post_ra>
// kernel: tpu_custom_call.1
= control target key start
LH: loop header
LB: loop body
LE: loop exit
PB: predicated region body
PF: predicated region fallthrough
CT: control target
= control target key end

     0   :  { %s933_s12 = smov 0   ;;  %s935_s13 = smov 0   ;;  %s1017_s0 = inlined_call_operand.vmem [shape: f32[2,128,9], index: 0, kind: input, shape index: {}]   ;;  %s1018_s1 = inlined_call_operand.vmem [shape: bf16[2,9,16], index: 1, kind: input, shape index: {}]   ;;  %s1019_s2 = inlined_call_operand.vmem [shape: bf16[2,16,16], index: 2, kind: input, shape index: {}]   ;;  %s1020_s3 = inlined_call_operand.vmem [shape: f32[128,16], index: 3, kind: output, shape index: {}]  }
   0x1   :  { %s937_s14 = smov 0  }
   0x2 LB: > { %s749_s15 = sadd.s32 4294967295, %s908_s14   ;;  %s950_s16 = sadd.s32 1, %s908_s14   ;;  %s908_s14 = sphi %s937_s14, %s1023_s14   ;;  %s904_s13 = sphi %s935_s13, %s1022_s13   ;;  %s900_s12 = sphi %s933_s12, %s1021_s12  }
   0x3   : > { %s17_s17 = ssub.s32 %s908_s14, %s950_s16  ;;  %s20_s18 = sadd.s32 1, %s904_s13 }
   0x4   : > { %p18_p0 = scmp.eq.s32.totalorder %s17_s17, 0  ;;  %p27_p1 = scmp.ne.s32.totalorder %s904_s13, %s900_s12 }
   0x5   : > { %p28_p2 = scmp.eq.s32.totalorder %s908_s14, 0  ;;  %p752_p4 = scmp.ge.s32.totalorder %s908_s14, 4 }
   0x6   : > { %s959_s19 = scalar_select %p18_p0, %s904_s13, %s20_s18  }
   0x7   : > { %p29_p3 = por %p28_p2, %p27_p1  ;;  %127 = sbr.rel (%p752_p4) target bundleno = 20 (0x14), region = 24 }
   0xc   : > { %130 = sbr.rel (!%p29_p3) target bundleno = 20 (0x14), region = 28  ;;  %s132_s20 = sand.u32 (%p29_p3), 1, %s904_s13  }
   0xd   : > { %s786_s21 = sshll.u32 (%p29_p3), %s908_s14, 5  ;;  %s753_s22 = sshll.u32 (%p29_p3), %s132_s20, 6 }
   0xe   : > { %s137_s25 = scalar_lea.vmem (%p29_p3), %s1017_s0, %s786_s21  ;;  %s134_s26 = scalar_lea.vmem (%p29_p3), [#allocation2], %s753_s22 }
   0xf   : > { %v180_v0 = vld [vmem:[%s137_s25] sm:$0xff] (%p29_p3)  ;;  %v182_v1 = vld [vmem:[%s137_s25 + $0x8] sm:$0xff] (%p29_p3)  ;;  %v184_v2 = vld [vmem:[%s137_s25 + $0x10] sm:$0xff] (%p29_p3) }
  0x10   : > { %181 = vst [vmem:[%s134_s26] sm:$0xff] (%p29_p3), %v180_v0  ;;  %183 = vst [vmem:[%s134_s26 + $0x8] sm:$0xff] (%p29_p3), %v182_v1  ;;  %v186_v3 = vld [vmem:[%s137_s25 + $0x18] sm:$0xff] (%p29_p3)  ;;  %v188_v4 = vld [vmem:[%s137_s25 + $0x80] sm:$0xff] (%p29_p3) }
  0x11   : > { %185 = vst [vmem:[%s134_s26 + $0x10] sm:$0xff] %v184_v2  ;;  %v190_v5 = vld [vmem:[%s137_s25 + $0x88] sm:$0xff]  ;;  %187 = vst [vmem:[%s134_s26 + $0x18] sm:$0xff] %v186_v3  ;;  %v192_v6 = vld [vmem:[%s137_s25 + $0x90] sm:$0xff] }
  0x12   : > { %189 = vst [vmem:[%s134_s26 + $0x20] sm:$0xff] %v188_v4  ;;  %191 = vst [vmem:[%s134_s26 + $0x28] sm:$0xff] %v190_v5  ;;  %v194_v7 = vld [vmem:[%s137_s25 + $0x98] sm:$0xff] }
  0x13   : > { %193 = vst [vmem:[%s134_s26 + $0x30] sm:$0xff] %v192_v6  ;;  %195 = vst [vmem:[%s134_s26 + $0x38] sm:$0xff] %v194_v7 }
  0x14 PF: > { %p756_p5 = scmp.ge.s32.totalorder %s908_s14, 1  ;;  %p200_p6 = scmp.lt.s32.totalorder %s908_s14, 5 }
  0x16   : > { %p201_p7 = pnand %p756_p5, %p200_p6 }
  0x17   : > { %s207_s29 = sand.u32 (!%p201_p7), 1, %s900_s12   ;;  %s758_s11 = sshll.u32 (!%p201_p7), %s749_s15, 2 }
  0x18   : > { %204 = sbr.rel (%p201_p7) target bundleno = 460 (0x1cc), region = 66  ;;  %s757_s5 = sshll.u32 (!%p201_p7), %s207_s29, 6 }
  0x19   : > { %s209_s6 = scalar_lea.vmem (!%p201_p7), [#allocation2], %s757_s5  ;;  %p232_p8 = scmp.lt.s32.totalorder (!%p201_p7), %s758_s11, 15 }
  0x1d   : > { %v882_v8 = vld [vmem:[%s1018_s1] sm:$0x1f]   ;;  %vm268_vm0 = vcmask 1043456   ;;  %vm269_vm1 = vcmask 1044480   ;;  %v910_v9 = vmov 65535   ;;  %v239_v16 = vld [vmem:[%s209_s6 + $0x8] sm:$0xff] }
  0x1e   : > { %v270_v10 = vsel %vm268_vm0, 4294967295, %v910_v9  ;;  %v883_v11 = vld [vmem:[%s1018_s1 + $0x8] sm:$0x1f]   ;;  %v238_v15 = vld [vmem:[%s209_s6] sm:$0xff]  ;;  %vm261_vm2 = vcmask 72704   ;;  %v240_v20 = vld [vmem:[%s209_s6 + $0x10] sm:$0xff] }
  0x1f   : > { %v271_v12 = vsel %vm269_vm1, %v270_v10, 0  ;;  %v760_v17 = vld [vmem:[%s209_s6 + $0x20] sm:$0xff]  ;;  %v242_v18 = vpack.c.bf16 %v239_v16, %v238_v15  ;;  %v761_v19 = vld [vmem:[%s209_s6 + $0x28] sm:$0xff]  ;;  %v241_v21 = vld [vmem:[%s209_s6 + $0x18] sm:$0xff]  ;;  %v911_v27 = vmov 0.0   ;;  %vm912_vm3 = vmmov 0  }
  0x20   : > { %v273_v13 = vand.u32 %v882_v8, %v271_v12  ;;  %v336_v14 = vand.u32 %v883_v11, %v271_v12  ;;  %v249_v22 = vpack.c.bf16 %v761_v19, %v760_v17  ;;  %v243_v23 = vpack.c.bf16 %v241_v21, %v240_v20  ;;  %v762_v24 = vld [vmem:[%s209_s6 + $0x30] sm:$0xff]  ;;  %v763_v25 = vld [vmem:[%s209_s6 + $0x38] sm:$0xff]  ;;  %v884_v44 = vld [vmem:[%s1019_s2] sm:$0xff]   ;;  %s1025_s11 = smov (!%p232_p8, %s758_s11), 15 }
  0x21   : > { %v250_v26 = vpack.c.bf16 %v763_v25, %v762_v24  ;;  %809 = vmatprep.mubr.msk.bf16.mxu0 %vm261_vm2, %v242_v18  ;;  %vm503_vm4 = vcmask 130048   ;;  %v885_v55 = vld [vmem:[%s1019_s2 + $0x8] sm:$0xff]   ;;  %s759_s12 = sshll.u32 %s1025_s11, 3 }
  0x22   : > { %807 = vmatprep.subr.bf16.mxu0 %v273_v13  ;;  %813 = vmatprep.subr.bf16.mxu1 %v336_v14  ;;  %s235_s20 = scalar_lea.vmem %s1020_s3, %s759_s12 }
  0x23   : > { %808 = vmatpush3.bf16.msra.mxu0 %v273_v13  ;;  %814 = vmatpush3.bf16.msra.mxu1 %v336_v14 }
  0x24   : > { %815 = vmatprep.mubr.msk.bf16.mxu1 %vm261_vm2, %v249_v22  ;;  %819 = vmatprep.subr.bf16.mxu0 %v273_v13 }
  0x25   : > { %825 = vmatprep.subr.bf16.mxu1 %v336_v14 }
  0x26   : > { %810 = vmatmul.mubr.msk.bf16.vlgmr.msra.gmra.mxu0 %vm261_vm2, %v243_v23  ;;  %816 = vmatmul.mubr.msk.bf16.vlgmr.msra.gmra.mxu1 %vm261_vm2, %v250_v26 }
  0x27   : > { %820 = vmatpush3.bf16.msra.mxu0 %v273_v13  ;;  %826 = vmatpush3.bf16.msra.mxu1 %v336_v14 }
  0x28   : > { %821 = vmatprep.mubr.msk.bf16.mxu0 %vm261_vm2, %v249_v22  ;;  %827 = vmatprep.mubr.msk.bf16.mxu1 %vm261_vm2, %v242_v18 }
  0x29   : > { %831 = vmatprep.subr.bf16.mxu0 %v911_v27  ;;  %837 = vmatprep.subr.bf16.mxu1 %v911_v27 }
  0x2e   : > { %822 = vmatmul.mubr.msk.bf16.vlgmr.msra.gmra.mxu0 %vm261_vm2, %v250_v26  ;;  %828 = vmatmul.mubr.msk.bf16.vlgmr.msra.gmra.mxu1 %vm261_vm2, %v243_v23 }
  0x2f   : > { %833 = vmatprep.mubr.msk.bf16.mxu0 %vm912_vm3, %v911_v27  ;;  %839 = vmatprep.mubr.msk.bf16.mxu1 %vm912_vm3, %v911_v27 }
  0xe6   : > { %v811_v28 = vpop.f32.mrf.mxu0  ;;  %v817_v29 = vpop.f32.mrf.mxu1 }
  0xe7   : > { %v389_v45 = vsub.f32 %v811_v28, %v817_v29 }
  0xe8   : > { %v309_v30 = vpop.f32.mrf.mxu0  ;;  %v372_v31 = vpop.f32.mrf.mxu1 }
  0xe9   : > { %v387_v36 = vsub.f32 %v309_v30, %v372_v31 }
  0xea   : > { %v812_v32 = vpop.f32.mrf.mxu0  ;;  %v818_v33 = vpop.f32.mrf.mxu1 }
  0xeb   : > { %v390_v40 = vsub.f32 %v812_v32, %v818_v33 }
  0xec   : > { %v312_v34 = vpop.f32.mrf.mxu0  ;;  %v375_v35 = vpop.f32.mrf.mxu1 }
  0xed   : > { %v388_v37 = vsub.f32 %v312_v34, %v375_v35  ;;  %v392_v48 = vpack.c.bf16 %v390_v40, %v389_v45 }
  0xee   : > { %v823_v38 = vpop.f32.mrf.mxu0  ;;  %v829_v39 = vpop.f32.mrf.mxu1 }
  0xef   : > { %v391_v41 = vpack.c.bf16 %v388_v37, %v387_v36  ;;  %v485_v56 = vadd.f32 %v829_v39, %v823_v38 }
  0xf0   : > { %v427_v42 = vpop.f32.mrf.mxu0  ;;  %v476_v43 = vpop.f32.mrf.mxu1 }
  0xf1   : > { %832 = vmatpush3.bf16.msra.mxu0 %v391_v41  ;;  %v477_v51 = vadd.f32 %v476_v43, %v427_v42 }
  0xf2   : > { %v824_v46 = vpop.f32.mrf.mxu0  ;;  %v830_v47 = vpop.f32.mrf.mxu1  ;;  %843 = vmatprep.subr.bf16.mxu0 %v911_v27 }
  0xf3   : > { %v488_v53 = vadd.f32 %v830_v47, %v824_v46 }
  0xf4   : > { %v430_v49 = vpop.f32.mrf.mxu0  ;;  %v479_v50 = vpop.f32.mrf.mxu1  ;;  %834 = vmatmul.mubr.msk.bf16.vlgmr.msra.gmra.mxu0 %vm503_vm4, %v884_v44 }
  0xf5   : > { %v480_v52 = vadd.f32 %v479_v50, %v430_v49  ;;  %844 = vmatpush3.bf16.msra.mxu0 %v392_v48  ;;  %845 = vmatprep.mubr.msk.bf16.mxu0 %vm912_vm3, %v911_v27  ;;  %v492_v57 = vpack.c.bf16 %v488_v53, %v485_v56 }
  0xf7   : > { %v491_v54 = vpack.c.bf16 %v480_v52, %v477_v51 }
  0xf9   : > { %838 = vmatpush3.bf16.msra.mxu1 %v491_v54 }
  0xfa   : > { %849 = vmatprep.subr.bf16.mxu1 %v911_v27 }
  0xfc   : > { %840 = vmatmul.mubr.msk.bf16.vlgmr.msra.gmra.mxu1 %vm503_vm4, %v885_v55  ;;  %846 = vmatmul.mubr.msk.bf16.vlgmr.msra.gmra.mxu0 %vm503_vm4, %v884_v44 }
  0xfd   : > { %850 = vmatpush3.bf16.msra.mxu1 %v492_v57  ;;  %851 = vmatprep.mubr.msk.bf16.mxu1 %vm912_vm3, %v911_v27 }
 0x104   : > { %852 = vmatmul.mubr.msk.bf16.vlgmr.msra.gmra.mxu1 %vm503_vm4, %v885_v55 }
 0x1b4   : > { %v541_v58 = vpop.f32.mrf.mxu0 }
 0x1b6   : > { %v835_v59 = vpop.f32.mrf.mxu0 }
 0x1b8   : > { %v544_v60 = vpop.f32.mrf.mxu0 }
 0x1ba   : > { %v836_v61 = vpop.f32.mrf.mxu0 }
 0x1bc   : > { %v590_v62 = vpop.f32.mrf.mxu1  ;;  %v635_v63 = vpop.f32.mrf.mxu0 }
 0x1bd   : > { %v597_v0 = vsub.f32 %v541_v58, %v590_v62 }
 0x1be   : > { %v841_v1 = vpop.f32.mrf.mxu1  ;;  %v847_v2 = vpop.f32.mrf.mxu0 }
 0x1bf   : > { %599 = vst.msk [vmem:[%s235_s20] sm:$0xff] %vm503_vm4, %v597_v0 }
 0x1c0   : > { %v593_v3 = vpop.f32.mrf.mxu1  ;;  %v638_v4 = vpop.f32.mrf.mxu0 }
 0x1c1   : > { %v598_v5 = vsub.f32 %v544_v60, %v593_v3 }
 0x1c2   : > { %v842_v6 = vpop.f32.mrf.mxu1  ;;  %v848_v7 = vpop.f32.mrf.mxu0 }
 0x1c3   : > { %600 = vst.msk [vmem:[%s235_s20 + $0x8] sm:$0xff] %vm503_vm4, %v598_v5 }
 0x1c4   : > { %v676_v8 = vpop.f32.mrf.mxu1 }
 0x1c5   : > { %v683_v9 = vsub.f32 %v635_v63, %v676_v8 }
 0x1c6   : > { %v853_v10 = vpop.f32.mrf.mxu1 }
 0x1c7   : > { %685 = vst.msk [vmem:[%s235_s20 + $0x10] sm:$0xff] %vm503_vm4, %v683_v9 }
 0x1c8   : > { %v679_v11 = vpop.f32.mrf.mxu1 }
 0x1c9   : > { %v684_v12 = vsub.f32 %v638_v4, %v679_v11 }
 0x1ca   : > { %v854_v13 = vpop.f32.mrf.mxu1 }
 0x1cb   : > { %686 = vst.msk [vmem:[%s235_s20 + $0x18] sm:$0xff] %vm503_vm4, %v684_v12 }
 0x1cc PF: > { %p10_p9 = scmp.ge.s32.totalorder %s950_s16, 6   ;;  %s1021_s12 = smov %s904_s13 }
 0x1cd   : > { %s1022_s13 = smov %s959_s19  ;;  %s1023_s14 = smov %s950_s16 }
 0x1ce   :  { %12 = sbr.rel (!%p10_p9) target bundleno = 2 (0x2), region = 108 }

</bundles_post_ra>
